<compile_context>
chip_gen: v6e
topology: v6e:2x2x1
jax: 0.10.0
libtpu: 0.0.40
codegen_flags: <defaults>
</compile_context>

<pallas_src>
import jax
import jax.numpy as jnp
from jax.experimental import pallas as pl
from jax.experimental.pallas import tpu as pltpu

LANE = 128  # minimum lane-dense output tile; correct on v5e/v6e/v7x


def _round_up(x, m):
    return ((x + m - 1) // m) * m


def nsp_head_kernel(x_ref, w_ref, b_ref, o_ref):
    # (TB, H) @ (H, N_pad) + (1, N_pad) -> (TB, N_pad); f32 accumulation on MXU.
    acc = jnp.dot(x_ref[...], w_ref[...], preferred_element_type=jnp.float32)
    o_ref[...] = (acc + b_ref[...].astype(jnp.float32)).astype(o_ref.dtype)


def make_nsp_head_params(weight, bias, *, n_pad=LANE, param_dtype=None):
    """Pad/transpose torch-layout Linear params once at parameter-load time.

    weight: (N, H) torch layout, bias: (N,).
    Returns (w_pad, b_pad) of shape (H, n_pad) / (1, n_pad) with zero-padded
    extra columns (kept exact; sliced off after the kernel).
    """
    N, H = weight.shape
    n_pad = max(n_pad, _round_up(N, LANE))
    dtype = param_dtype if param_dtype is not None else weight.dtype
    w_pad = jnp.zeros((H, n_pad), dtype).at[:, :N].set(weight.T.astype(dtype))
    b_pad = jnp.zeros((1, n_pad), dtype).at[:, :N].set(bias.astype(dtype)[None, :])
    return w_pad, b_pad


def albert_only_nsp_head(pooled_output, w_pad, b_pad, *, num_labels=2,
                         block_b=1024, vmem_budget_bytes=40 * 2 ** 20,
                         single_buffer_params=True, return_padded=False):
    """y = pooled_output @ W^T + b  with pre-padded params from make_nsp_head_params."""
    B, H = pooled_output.shape
    H_w, n_pad = w_pad.shape
    assert H == H_w, "weight in_features must match hidden size"
    assert n_pad % LANE == 0

    x_bytes = jnp.dtype(pooled_output.dtype).itemsize
    w_bytes = jnp.dtype(w_pad.dtype).itemsize
    out_dtype = pooled_output.dtype
    out_bytes = jnp.dtype(out_dtype).itemsize
    sub = 16 if x_bytes == 2 else 8  # sublane tile (bf16 packs 16 rows / vreg)

    # ---- batch-tile selection -------------------------------------------------
    if B > block_b:
        tb = block_b                                   # big tiles amortize grid overhead
    else:
        tb = max(sub, _round_up(pl.cdiv(B, 2), sub))   # >=2 programs for v7x's 2 TCs
        tb = min(tb, _round_up(B, sub))
    # Cap so double-buffered x + out tiles plus (<=2) weight copies fit the
    # v7x-safe VMEM budget.
    per_row = 2 * H * x_bytes + 2 * n_pad * out_bytes
    fixed = 2 * (H + 8) * n_pad * w_bytes
    tb_cap = max(sub, ((max(vmem_budget_bytes - fixed, per_row)) // per_row) // sub * sub)
    tb = max(sub, min(tb, tb_cap))

    grid = (pl.cdiv(B, tb),)
    vmem_need = tb * per_row + fixed + (1 << 20)
    vmem_limit = int(min(max(vmem_need, 16 * 2 ** 20), 64 * 2 ** 20))

    x_spec = pl.BlockSpec((tb, H), lambda i: (i, 0))
    out_spec = pl.BlockSpec((tb, n_pad), lambda i: (i, 0))

    def _param_specs(single):
        if single:
            return [
                pl.BlockSpec((H, n_pad), lambda i: (0, 0), pipeline_mode=pl.Buffered(1)),
                pl.BlockSpec((1, n_pad), lambda i: (0, 0), pipeline_mode=pl.Buffered(1)),
            ]
        return [
            pl.BlockSpec((H, n_pad), lambda i: (0, 0)),
            pl.BlockSpec((1, n_pad), lambda i: (0, 0)),
        ]

    cost = pl.CostEstimate(
        flops=2 * B * H * num_labels,
        bytes_accessed=B * H * x_bytes + H * n_pad * w_bytes + B * n_pad * out_bytes,
        transcendentals=0,
    )

    def _run(single):
        return pl.pallas_call(
            nsp_head_kernel,
            out_shape=jax.ShapeDtypeStruct((B, n_pad), out_dtype),
            grid=grid,
            in_specs=[x_spec] + _param_specs(single),
            out_specs=out_spec,
            compiler_params=pltpu.CompilerParams(
                dimension_semantics=("parallel",),
                vmem_limit_bytes=vmem_limit),
            cost_estimate=cost,
        )(pooled_output, w_pad, b_pad)

    if single_buffer_params:
        try:
            out = _run(True)
        except Exception:
            # Fallback for JAX versions without BlockSpec pipeline_mode support.
            out = _run(False)
    else:
        out = _run(False)

    if return_padded:
        # Lane-dense (B, 128) tile; a jit-fused consumer slices the 2 real
        # columns for free instead of paying a separate full-output pass here.
        return out
    return out[:, :num_labels]


if __name__ == "__main__":
    # Small shapes consistent with the module: pooled_output is (batch, hidden).
    B, H, N = 2, 32, 2

    key = jax.random.PRNGKey(0)
    kx, kw, kb = jax.random.split(key, 3)
    pooled_output = jax.random.normal(kx, (B, H), jnp.float32)   # native dtype, no upcast
    weight = jax.random.normal(kw, (N, H), jnp.float32) * 0.02   # torch (out, in) layout
    bias = jax.random.normal(kb, (N,), jnp.float32) * 0.02

    # Pad/transpose parameters ONCE (parameter-load time), not per call.
    w_pad, b_pad = make_nsp_head_params(weight, bias)

    logits = albert_only_nsp_head(pooled_output, w_pad, b_pad, num_labels=N)
    logits = jax.block_until_ready(logits)

    # Pure-JAX reference (torch Linear semantics).
    ref = pooled_output @ weight.T + bias
    assert logits.shape == (B, N)
    assert jnp.allclose(logits, ref, atol=1e-4, rtol=1e-4), (
        "kernel output does not match reference")

    print("KERNEL_OK")
</pallas_src>

<mosaic_0001>
module attributes {stable_mosaic.version = 11 : i64} {
  func.func @nsp_head_kernel(%arg0: i32, %arg1: memref<8x32xf32, #tpu.memory_space<vmem>>, %arg2: memref<32x128xf32, #tpu.memory_space<vmem>>, %arg3: memref<1x128xf32, #tpu.memory_space<vmem>>, %arg4: memref<8x128xf32, #tpu.memory_space<vmem>>) attributes {dimension_semantics = [#tpu.dimension_semantics<parallel>], iteration_bounds = array<i64: 1>, scalar_prefetch = 0 : i64, scratch_operands = 0 : i64, tpu.core_type = #tpu.core_type<tc>, window_params = [{transform_indices = @transform_0, window_bounds = array<i64: 8, 32>}, {pipeline_mode = #tpu.pipeline_mode<synchronous>, transform_indices = @transform_1, window_bounds = array<i64: 32, 128>}, {pipeline_mode = #tpu.pipeline_mode<synchronous>, transform_indices = @transform_2, window_bounds = array<i64: 1, 128>}, {transform_indices = @transform_3, window_bounds = array<i64: 8, 128>}]} {
    %c0 = arith.constant 0 : index
    %c0_0 = arith.constant 0 : index
    %0 = vector.load %arg1[%c0, %c0_0] : memref<8x32xf32, #tpu.memory_space<vmem>>, vector<8x32xf32>
    %c0_1 = arith.constant 0 : index
    %c0_2 = arith.constant 0 : index
    %1 = vector.load %arg2[%c0_1, %c0_2] : memref<32x128xf32, #tpu.memory_space<vmem>>, vector<32x128xf32>
    %cst = arith.constant dense<0.000000e+00> : vector<8x128xf32>
    %2 = tpu.matmul %0, %1, %cst {dimension_numbers = #tpu.dot_dimension_numbers<[1], [0], [0], [1], [0, 0, 1, 1], [], []>} : vector<8x32xf32>, vector<32x128xf32>, vector<8x128xf32> -> vector<8x128xf32>
    %c0_3 = arith.constant 0 : index
    %c0_4 = arith.constant 0 : index
    %3 = vector.load %arg3[%c0_3, %c0_4] : memref<1x128xf32, #tpu.memory_space<vmem>>, vector<1x128xf32>
    %4 = vector.broadcast %3 : vector<1x128xf32> to vector<8x128xf32>
    %5 = arith.addf %2, %4 : vector<8x128xf32>
    %c0_5 = arith.constant 0 : index
    %c0_6 = arith.constant 0 : index
    %6 = vector.load %arg4[%c0_5, %c0_6] : memref<8x128xf32, #tpu.memory_space<vmem>>, vector<8x128xf32>
    tpu.vector_store %arg4[%c0_5, %c0_6], %5 {strides = array<i32>} : memref<8x128xf32, #tpu.memory_space<vmem>>, vector<8x128xf32>,
    return
  }
  func.func @transform_0(%arg0: i32) -> (i32, i32) {
    %c0_i32 = arith.constant 0 : i32
    %c0_i32_0 = arith.constant 0 : i32
    return %arg0, %c0_i32 : i32, i32
  }
  func.func @transform_1(%arg0: i32) -> (i32, i32) {
    %c0_i32 = arith.constant 0 : i32
    %c0_i32_0 = arith.constant 0 : i32
    %c0_i32_1 = arith.constant 0 : i32
    return %c0_i32, %c0_i32_0 : i32, i32
  }
  func.func @transform_2(%arg0: i32) -> (i32, i32) {
    %c0_i32 = arith.constant 0 : i32
    %c0_i32_0 = arith.constant 0 : i32
    %c0_i32_1 = arith.constant 0 : i32
    return %c0_i32, %c0_i32_0 : i32, i32
  }
  func.func @transform_3(%arg0: i32) -> (i32, i32) {
    %c0_i32 = arith.constant 0 : i32
    %c0_i32_0 = arith.constant 0 : i32
    return %arg0, %c0_i32 : i32, i32
  }
}

module attributes {stable_mosaic.version = 11 : i64} {
  func.func @nsp_head_kernel(%arg0: i32, %arg1: memref<8x32xf32, #tpu.memory_space<vmem>>, %arg2: memref<32x128xf32, #tpu.memory_space<vmem>>, %arg3: memref<1x128xf32, #tpu.memory_space<vmem>>, %arg4: memref<8x128xf32, #tpu.memory_space<vmem>>) attributes {dimension_semantics = [#tpu.dimension_semantics<parallel>], iteration_bounds = array<i64: 1>, scalar_prefetch = 0 : i64, scratch_operands = 0 : i64, tpu.core_type = #tpu.core_type<tc>, window_params = [{transform_indices = @transform_0, window_bounds = array<i64: 8, 32>}, {pipeline_mode = #tpu.pipeline_mode<synchronous>, transform_indices = @transform_1, window_bounds = array<i64: 32, 128>}, {pipeline_mode = #tpu.pipeline_mode<synchronous>, transform_indices = @transform_2, window_bounds = array<i64: 1, 128>}, {transform_indices = @transform_3, window_bounds = array<i64: 8, 128>}]} {
    %c0 = arith.constant 0 : index
    %c0_0 = arith.constant 0 : index
    %0 = vector.load %arg1[%c0, %c0_0] : memref<8x32xf32, #tpu.memory_space<vmem>>, vector<8x32xf32>
    %c0_1 = arith.constant 0 : index
    %c0_2 = arith.constant 0 : index
    %1 = vector.load %arg2[%c0_1, %c0_2] : memref<32x128xf32, #tpu.memory_space<vmem>>, vector<32x128xf32>
    %cst = arith.constant dense<0.000000e+00> : vector<8x128xf32>
    %2 = tpu.matmul %0, %1, %cst {dimension_numbers = #tpu.dot_dimension_numbers<[1], [0], [0], [1], [0, 0, 1, 1], [], []>} : vector<8x32xf32>, vector<32x128xf32>, vector<8x128xf32> -> vector<8x128xf32>
    %c0_3 = arith.constant 0 : index
    %c0_4 = arith.constant 0 : index
    %3 = vector.load %arg3[%c0_3, %c0_4] : memref<1x128xf32, #tpu.memory_space<vmem>>, vector<1x128xf32>
    %4 = vector.broadcast %3 : vector<1x128xf32> to vector<8x128xf32>
    %5 = arith.addf %2, %4 : vector<8x128xf32>
    %c0_5 = arith.constant 0 : index
    %c0_6 = arith.constant 0 : index
    %6 = vector.load %arg4[%c0_5, %c0_6] : memref<8x128xf32, #tpu.memory_space<vmem>>, vector<8x128xf32>
    tpu.vector_store %arg4[%c0_5, %c0_6], %5 {strides = array<i32>} : memref<8x128xf32, #tpu.memory_space<vmem>>, vector<8x128xf32>,
    return
  }
  func.func @transform_0(%arg0: i32) -> (i32, i32) {
    %c0_i32 = arith.constant 0 : i32
    %c0_i32_0 = arith.constant 0 : i32
    return %arg0, %c0_i32 : i32, i32
  }
  func.func @transform_1(%arg0: i32) -> (i32, i32) {
    %c0_i32 = arith.constant 0 : i32
    %c0_i32_0 = arith.constant 0 : i32
    %c0_i32_1 = arith.constant 0 : i32
    return %c0_i32, %c0_i32_0 : i32, i32
  }
  func.func @transform_2(%arg0: i32) -> (i32, i32) {
    %c0_i32 = arith.constant 0 : i32
    %c0_i32_0 = arith.constant 0 : i32
    %c0_i32_1 = arith.constant 0 : i32
    return %c0_i32, %c0_i32_0 : i32, i32
  }
  func.func @transform_3(%arg0: i32) -> (i32, i32) {
    %c0_i32 = arith.constant 0 : i32
    %c0_i32_0 = arith.constant 0 : i32
    return %arg0, %c0_i32 : i32, i32
  }
}

</mosaic_0001>

<bundles_post_ra>
// kernel: tpu_custom_call.1
= control target key start
LH: loop header
LB: loop body
LE: loop exit
PB: predicated region body
PF: predicated region fallthrough
CT: control target
= control target key end

     0   :  { %8 = vsyncpa [#allocation3], 0  ;;  %s288_s0 = inlined_call_operand.hbm [shape: f32[2,32], index: 0, kind: input, shape index: {}]   ;;  %s289_s1 = inlined_call_operand.hbm [shape: f32[32,128], index: 1, kind: input, shape index: {}]   ;;  %s290_s2 = inlined_call_operand.vmem [shape: f32[1,128], index: 2, kind: input, shape index: {}]   ;;  %s291_s3 = inlined_call_operand.hbm [shape: f32[2,128], index: 3, kind: output, shape index: {}]  }
   0x1   :  { %9 = vsyncpa [#allocation6], 0 }
   0x2   :  { %10 = vsyncpa [#allocation4], 0 }
   0x3   :  { %15 = vsyncadd [#allocation3], 96  ;;  %s241_s12 = smov [#allocation2]  }
   0x4   :  { %s16_s13 = sshll.u32 %s241_s12, 4  ;;  %s17_s13 = int_to_ptr.vmem [resolvable:$true] %s16_s13 }
   0x5   :  { %s183_s14 = scalar_lea.vmem %s17_s13, 32  ;;  %s187_s15 = scalar_lea.vmem %s17_s13, 128 }
   0x6   :  { %p184_p0 = scmp.ne.s32.totalorder %s17_s13, %s183_s14  ;;  %p188_p1 = scmp.lt.s32.totalorder %s17_s13, %s17_s13 }
   0x7   :  { %p189_p2 = scmp.lt.s32.totalorder %s187_s15, %s183_s14 }
   0x9   :  { %p190_p3 = por %p189_p2, %p188_p1 }
   0xb   :  { %p191_p4 = pnand %p190_p3, %p184_p0 }
   0xd   :  { %194 = shalt.err (!%p191_p4)
}
   0xe   :  { %s242_s16 = smov 32   ;;  %s243_s17 = smov 2  }
   0xf   :  { %22 = dma.hbm_to_vmem [thread:$0]  %s288_s0, 32, %s17_s13, [#allocation3], %s242_s16, %s242_s16, %s243_s17  }
  0x10   :  { %s244_s20 = smov [#allocation5]  }
  0x11   :  { %s28_s21 = sshll.u32 %s244_s20, 4  ;;  %s29_s21 = int_to_ptr.vmem [resolvable:$true] %s28_s21 }
  0x12   :  { %s203_s22 = scalar_lea.vmem %s29_s21, 512  ;;  %p208_p6 = scmp.lt.s32.totalorder %s29_s21, %s29_s21 }
  0x13   :  { %p204_p5 = scmp.ne.s32.totalorder %s29_s21, %s203_s22  ;;  %p209_p7 = scmp.lt.s32.totalorder %s203_s22, %s203_s22 }
  0x15   :  { %p210_p8 = por %p209_p7, %p208_p6 }
  0x17   :  { %p211_p9 = pnand %p210_p8, %p204_p5 }
  0x19   :  { %214 = shalt.err (!%p211_p9)
}
  0x1a   :  { %s245_s23 = smov 128   ;;  %s246_s24 = smov 8  }
  0x1b   :  { %34 = dma.hbm_to_vmem [thread:$0]  %s289_s1, 512, %s29_s21, [#allocation6], %s245_s23, %s245_s23, %s246_s24  }
  0x1c   :  { %235 = dma.done.wait [#allocation3], 128  }
  0x1d   :  { %236 = vsyncadd [#allocation3], 4294967168 }
  0x1e   :  { %237 = dma.done.wait [#allocation6], 512  }
  0x1f   :  { %238 = vsyncadd [#allocation6], 4294966784  ;;  %v247_v0 = vmov 0.0   ;;  %vm248_vm0 = vmmov 0   ;;  %v47_v1 = vld [vmem:[#allocation5 + $0x18] sm:$0xff]  ;;  %v46_v2 = vld [vmem:[#allocation5 + $0x10] sm:$0xff] }
  0x20   :  { %155 = vmatprep.subr.mxu0 %v247_v0  ;;  %163 = vmatprep.mubr.msk.f32.mxu0 %vm248_vm0, %v247_v0  ;;  %v45_v3 = vld [vmem:[#allocation5 + $0x8] sm:$0xff]  ;;  %v44_v4 = vld [vmem:[#allocation5] sm:$0xff]  ;;  %v43_v5 = vld [vmem:[#allocation2] sm:$0xff]  ;;  %vm55_vm1 = vcmask 261120  }
  0x21   :  { %156 = vmatpush3.msra.mxu0 %v47_v1  ;;  %v148_v6 = vld [vmem:[%s290_s2] ss:$0 sm:$0xff] }
  0x22   :  { %157 = vmatprep.subr.mxu0 %v247_v0 }
  0x23   :  { %158 = vmatpush3.msra.mxu0 %v46_v2 }
  0x24   :  { %159 = vmatprep.subr.mxu0 %v247_v0 }
  0x25   :  { %160 = vmatpush3.msra.mxu0 %v45_v3 }
  0x26   :  { %161 = vmatprep.subr.mxu0 %v247_v0 }
  0x27   :  { %162 = vmatpush3.msra.mxu0 %v44_v4 }
  0x28   :  { %164 = vmatmul.mubr.msk.f32.vlgmr.msra.gmra.mxu0 %vm55_vm1, %v43_v5 }
  0xe8   :  { %v125_v7 = vpop.f32.mrf.mxu0 }
  0xe9   :  { %v126_v8 = vadd.f32 %v148_v6, %v125_v7 }
  0xea   :  { %v165_v9 = vpop.f32.mrf.mxu0 }
  0xeb   :  { %129 = vst [vmem:[#allocation7] sm:$0xff] %v126_v8 }
  0xec   :  { %134 = vsyncadd [#allocation4], 96  ;;  %s249_s27 = smov [#allocation7]  }
  0xed   :  { %s135_s28 = sshll.u32 %s249_s27, 4  ;;  %s136_s28 = int_to_ptr.vmem [resolvable:$true] %s135_s28 }
  0xee   :  { %s215_s29 = scalar_lea.vmem %s136_s28, 32  ;;  %s219_s30 = scalar_lea.vmem %s136_s28, 128 }
  0xef   :  { %p216_p10 = scmp.ne.s32.totalorder %s136_s28, %s215_s29  ;;  %p220_p11 = scmp.lt.s32.totalorder %s136_s28, %s136_s28 }
  0xf0   :  { %p221_p12 = scmp.lt.s32.totalorder %s219_s30, %s215_s29 }
  0xf2   :  { %p222_p13 = por %p221_p12, %p220_p11 }
  0xf4   :  { %p223_p0 = pnand %p222_p13, %p216_p10 }
  0xf6   :  { %226 = shalt.err (!%p223_p0)
}
  0xf7   :  { %141 = dma.vmem_to_hbm [thread:$0]  %s136_s28, 32, %s291_s3, [#allocation4], %s242_s16, %s242_s16, %s243_s17  }
  0xf8   :  { %239 = dma.done.wait [#allocation4], 128  }
  0xf9   :  { %240 = vsyncadd [#allocation4], 4294967168 }
  0xfa   :  { %145 = vsyncpa [#allocation3], 1 }
  0xfb   :  { %146 = vsyncpa [#allocation6], 1 }
  0xfc   :  { %147 = vsyncpa [#allocation4], 1 }

// kernel: tpu_custom_call.1
= control target key start
LH: loop header
LB: loop body
LE: loop exit
PB: predicated region body
PF: predicated region fallthrough
CT: control target
= control target key end

     0   :  { %8 = vsyncpa [#allocation3], 0  ;;  %s288_s0 = inlined_call_operand.hbm [shape: f32[2,32], index: 0, kind: input, shape index: {}]   ;;  %s289_s1 = inlined_call_operand.hbm [shape: f32[32,128], index: 1, kind: input, shape index: {}]   ;;  %s290_s2 = inlined_call_operand.vmem [shape: f32[1,128], index: 2, kind: input, shape index: {}]   ;;  %s291_s3 = inlined_call_operand.hbm [shape: f32[2,128], index: 3, kind: output, shape index: {}]  }
   0x1   :  { %9 = vsyncpa [#allocation6], 0 }
   0x2   :  { %10 = vsyncpa [#allocation4], 0 }
   0x3   :  { %15 = vsyncadd [#allocation3], 96  ;;  %s241_s12 = smov [#allocation2]  }
   0x4   :  { %s16_s13 = sshll.u32 %s241_s12, 4  ;;  %s17_s13 = int_to_ptr.vmem [resolvable:$true] %s16_s13 }
   0x5   :  { %s183_s14 = scalar_lea.vmem %s17_s13, 32  ;;  %s187_s15 = scalar_lea.vmem %s17_s13, 128 }
   0x6   :  { %p184_p0 = scmp.ne.s32.totalorder %s17_s13, %s183_s14  ;;  %p188_p1 = scmp.lt.s32.totalorder %s17_s13, %s17_s13 }
   0x7   :  { %p189_p2 = scmp.lt.s32.totalorder %s187_s15, %s183_s14 }
   0x9   :  { %p190_p3 = por %p189_p2, %p188_p1 }
   0xb   :  { %p191_p4 = pnand %p190_p3, %p184_p0 }
   0xd   :  { %194 = shalt.err (!%p191_p4)
}
   0xe   :  { %s242_s16 = smov 32   ;;  %s243_s17 = smov 2  }
   0xf   :  { %22 = dma.hbm_to_vmem [thread:$0]  %s288_s0, 32, %s17_s13, [#allocation3], %s242_s16, %s242_s16, %s243_s17  }
  0x10   :  { %s244_s20 = smov [#allocation5]  }
  0x11   :  { %s28_s21 = sshll.u32 %s244_s20, 4  ;;  %s29_s21 = int_to_ptr.vmem [resolvable:$true] %s28_s21 }
  0x12   :  { %s203_s22 = scalar_lea.vmem %s29_s21, 512  ;;  %p208_p6 = scmp.lt.s32.totalorder %s29_s21, %s29_s21 }
  0x13   :  { %p204_p5 = scmp.ne.s32.totalorder %s29_s21, %s203_s22  ;;  %p209_p7 = scmp.lt.s32.totalorder %s203_s22, %s203_s22 }
  0x15   :  { %p210_p8 = por %p209_p7, %p208_p6 }
  0x17   :  { %p211_p9 = pnand %p210_p8, %p204_p5 }
  0x19   :  { %214 = shalt.err (!%p211_p9)
}
  0x1a   :  { %s245_s23 = smov 128   ;;  %s246_s24 = smov 8  }
  0x1b   :  { %34 = dma.hbm_to_vmem [thread:$0]  %s289_s1, 512, %s29_s21, [#allocation6], %s245_s23, %s245_s23, %s246_s24  }
  0x1c   :  { %235 = dma.done.wait [#allocation3], 128  }
  0x1d   :  { %236 = vsyncadd [#allocation3], 4294967168 }
  0x1e   :  { %237 = dma.done.wait [#allocation6], 512  }
  0x1f   :  { %238 = vsyncadd [#allocation6], 4294966784  ;;  %v247_v0 = vmov 0.0   ;;  %vm248_vm0 = vmmov 0   ;;  %v47_v1 = vld [vmem:[#allocation5 + $0x18] sm:$0xff]  ;;  %v46_v2 = vld [vmem:[#allocation5 + $0x10] sm:$0xff] }
  0x20   :  { %155 = vmatprep.subr.mxu0 %v247_v0  ;;  %163 = vmatprep.mubr.msk.f32.mxu0 %vm248_vm0, %v247_v0  ;;  %v45_v3 = vld [vmem:[#allocation5 + $0x8] sm:$0xff]  ;;  %v44_v4 = vld [vmem:[#allocation5] sm:$0xff]  ;;  %v43_v5 = vld [vmem:[#allocation2] sm:$0xff]  ;;  %vm55_vm1 = vcmask 261120  }
  0x21   :  { %156 = vmatpush3.msra.mxu0 %v47_v1  ;;  %v148_v6 = vld [vmem:[%s290_s2] ss:$0 sm:$0xff] }
  0x22   :  { %157 = vmatprep.subr.mxu0 %v247_v0 }
  0x23   :  { %158 = vmatpush3.msra.mxu0 %v46_v2 }
  0x24   :  { %159 = vmatprep.subr.mxu0 %v247_v0 }
  0x25   :  { %160 = vmatpush3.msra.mxu0 %v45_v3 }
  0x26   :  { %161 = vmatprep.subr.mxu0 %v247_v0 }
  0x27   :  { %162 = vmatpush3.msra.mxu0 %v44_v4 }
  0x28   :  { %164 = vmatmul.mubr.msk.f32.vlgmr.msra.gmra.mxu0 %vm55_vm1, %v43_v5 }
  0xe8   :  { %v125_v7 = vpop.f32.mrf.mxu0 }
  0xe9   :  { %v126_v8 = vadd.f32 %v148_v6, %v125_v7 }
  0xea   :  { %v165_v9 = vpop.f32.mrf.mxu0 }
  0xeb   :  { %129 = vst [vmem:[#allocation7] sm:$0xff] %v126_v8 }
  0xec   :  { %134 = vsyncadd [#allocation4], 96  ;;  %s249_s27 = smov [#allocation7]  }
  0xed   :  { %s135_s28 = sshll.u32 %s249_s27, 4  ;;  %s136_s28 = int_to_ptr.vmem [resolvable:$true] %s135_s28 }
  0xee   :  { %s215_s29 = scalar_lea.vmem %s136_s28, 32  ;;  %s219_s30 = scalar_lea.vmem %s136_s28, 128 }
  0xef   :  { %p216_p10 = scmp.ne.s32.totalorder %s136_s28, %s215_s29  ;;  %p220_p11 = scmp.lt.s32.totalorder %s136_s28, %s136_s28 }
  0xf0   :  { %p221_p12 = scmp.lt.s32.totalorder %s219_s30, %s215_s29 }
  0xf2   :  { %p222_p13 = por %p221_p12, %p220_p11 }
  0xf4   :  { %p223_p0 = pnand %p222_p13, %p216_p10 }
  0xf6   :  { %226 = shalt.err (!%p223_p0)
}
  0xf7   :  { %141 = dma.vmem_to_hbm [thread:$0]  %s136_s28, 32, %s291_s3, [#allocation4], %s242_s16, %s242_s16, %s243_s17  }
  0xf8   :  { %239 = dma.done.wait [#allocation4], 128  }
  0xf9   :  { %240 = vsyncadd [#allocation4], 4294967168 }
  0xfa   :  { %145 = vsyncpa [#allocation3], 1 }
  0xfb   :  { %146 = vsyncpa [#allocation6], 1 }
  0xfc   :  { %147 = vsyncpa [#allocation4], 1 }

</bundles_post_ra>
